<compile_context>
chip_gen: v7x
topology: tpu7x:2x2x1
jax: 0.10.0
libtpu: 0.0.40
codegen_flags: <defaults>
</compile_context>

<pallas_src>
import jax
import jax.numpy as jnp
import numpy as np
from jax.experimental import pallas as pl
from jax.experimental.pallas import tpu as pltpu

ATT_DIM = 256  # fixed by the module (W: 256 x 256, V: 256 x 1)
SCALE = ATT_DIM ** (-0.5)


def _attention_kernel(x_ref, w_ref, v_ref, o_ref):
    # x_ref: (BB, C, T)  -- native PyTorch layout, no host permute
    # w_ref: (C, D), v_ref: (1, D), o_ref: (BB, C)
    bb, c, t = x_ref.shape

    x_ct = x_ref[...]                                   # (BB, C, T) f32
    x_tc = jnp.transpose(x_ct, (0, 2, 1))               # (BB, T, C) on-chip XLU transpose
    x2d = x_tc.reshape(bb * t, c)                       # (BB*T, C) -> fills MXU M-dim

    # e = tanh(x @ W) @ V * scale
    h = jnp.tanh(jnp.dot(x2d, w_ref[...],
                         preferred_element_type=jnp.float32))      # (BB*T, D)
    h3 = h.reshape(bb, t, -1)                                       # (BB, T, D)
    e = jnp.sum(h3 * v_ref[...], axis=-1, keepdims=True) * SCALE    # (BB, T, 1)

    # softmax over T (match torch exactly: exp / sum(exp), no max subtraction)
    n1 = jnp.exp(e)                                     # (BB, T, 1)
    n2 = jnp.sum(n1, axis=1, keepdims=True)             # (BB, 1, 1)
    alpha = n1 / n2                                     # exact divide (keeps 1e-5 parity)

    # weighted sum over T -> lane-dense (BB, C) output block (sublane reduce)
    o_ref[...] = jnp.sum(alpha * x_tc, axis=1)          # (BB, C)


def _pick_block_batch(B, T, C=ATT_DIM, vmem_budget_bytes=8 * 1024 * 1024):
    """Pick BB (batch elements per grid step).

    Goals:
      * BB divides B.
      * BB*T ~ 256 rows to fill the MXU M-dim.
      * Output block (BB, C) stays sublane-aligned (BB % 8 == 0) or covers the
        full batch (block == full array dim is always legal).
      * The x tile (double-buffered by the pipeline) plus the in-kernel
        transposed copy stay inside a conservative VMEM budget.
    """
    per_batch_bytes = C * max(T, 1) * 4
    # ~4x factor: 2x pipeline double-buffer of the input tile + ~2x in-kernel
    # temporaries (transposed copy / alpha*x product).
    max_by_vmem = max(1, vmem_budget_bytes // (4 * per_batch_bytes))
    target = max(1, min(256 // max(T, 1), max_by_vmem))

    cands = [bb for bb in range(1, B + 1)
             if B % bb == 0 and (bb % 8 == 0 or bb == B)]
    fitting = [bb for bb in cands if bb <= target]
    return max(fitting) if fitting else min(cands)


def attention_forward(x, W, V):
    """x: (B, C=256, T) float32; W: (C, D); V: (D, 1). Returns (B, C) float32."""
    B, C, T = x.shape
    D = W.shape[1]
    BB = _pick_block_batch(B, T, C)
    v_row = V.reshape(1, D)                             # lane-dense V (free reshape)

    return pl.pallas_call(
        _attention_kernel,
        out_shape=jax.ShapeDtypeStruct((B, C), jnp.float32),
        grid_spec=pltpu.PrefetchScalarGridSpec(
            num_scalar_prefetch=0,
            grid=(B // BB,),
            in_specs=[
                pl.BlockSpec((BB, C, T), lambda b: (b, 0, 0)),   # x, native layout
                pl.BlockSpec((C, D), lambda b: (0, 0)),          # W (constant block)
                pl.BlockSpec((1, D), lambda b: (0, 0)),          # V as row vector
            ],
            out_specs=pl.BlockSpec((BB, C), lambda b: (b, 0)),
        ),
        compiler_params=pltpu.CompilerParams(
            dimension_semantics=("parallel",),   # shards batch-tiles across TCs (v7x)
        ),
    )(x, W, v_row)


def _reference(x, W, V):
    # Pure-JAX reference mirroring the PyTorch forward exactly.
    xt = jnp.transpose(x, (0, 2, 1))                    # (B, T, C)
    e = jnp.matmul(jnp.tanh(jnp.matmul(xt, W)), V) * SCALE
    n1 = jnp.exp(e)
    n2 = jnp.sum(n1, axis=1, keepdims=True)
    alpha = n1 / n2
    return jnp.sum(alpha * xt, axis=1)


if __name__ == "__main__":
    key = jax.random.PRNGKey(0)
    k_x, k_w, k_v = jax.random.split(key, 3)

    B, C, T = 2, 256, 8                                 # C fixed to 256 by the module
    x = jax.random.normal(k_x, (B, C, T), dtype=jnp.float32)
    W = jax.random.normal(k_w, (C, ATT_DIM), dtype=jnp.float32)
    V = jax.random.normal(k_v, (ATT_DIM, 1), dtype=jnp.float32)

    out = attention_forward(x, W, V)
    out = jax.block_until_ready(out)

    ref = _reference(x, W, V)
    np.testing.assert_allclose(np.asarray(out), np.asarray(ref),
                               rtol=1e-5, atol=1e-5)
    print("KERNEL_OK")
</pallas_src>

<mosaic_0001>
module attributes {stable_mosaic.version = 11 : i64} {
  func.func @_attention_kernel(%arg0: i32, %arg1: memref<2x256x8xf32, #tpu.memory_space<vmem>>, %arg2: memref<256x256xf32, #tpu.memory_space<vmem>>, %arg3: memref<1x256xf32, #tpu.memory_space<vmem>>, %arg4: memref<2x256xf32, #tpu.memory_space<vmem>>) attributes {dimension_semantics = [#tpu.dimension_semantics<parallel>], iteration_bounds = array<i64: 1>, scalar_prefetch = 0 : i64, scratch_operands = 0 : i64, tpu.core_type = #tpu.core_type<tc>, window_params = [{transform_indices = @transform_0, window_bounds = array<i64: 2, 256, 8>}, {pipeline_mode = #tpu.pipeline_mode<synchronous>, transform_indices = @transform_1, window_bounds = array<i64: 256, 256>}, {pipeline_mode = #tpu.pipeline_mode<synchronous>, transform_indices = @transform_2, window_bounds = array<i64: 1, 256>}, {transform_indices = @transform_3, window_bounds = array<i64: 2, 256>}]} {
    %c0 = arith.constant 0 : index
    %c0_0 = arith.constant 0 : index
    %c0_1 = arith.constant 0 : index
    %0 = vector.load %arg1[%c0, %c0_0, %c0_1] : memref<2x256x8xf32, #tpu.memory_space<vmem>>, vector<2x256x8xf32>
    %1 = tpu.transpose %0, [0, 2, 1] : vector<2x256x8xf32> -> vector<2x8x256xf32>
    %2 = vector.shape_cast %1 : vector<2x8x256xf32> to vector<16x256xf32>
    %c0_2 = arith.constant 0 : index
    %c0_3 = arith.constant 0 : index
    %3 = vector.load %arg2[%c0_2, %c0_3] : memref<256x256xf32, #tpu.memory_space<vmem>>, vector<256x256xf32>
    %cst = arith.constant dense<0.000000e+00> : vector<16x256xf32>
    %4 = tpu.matmul %2, %3, %cst {dimension_numbers = #tpu.dot_dimension_numbers<[1], [0], [0], [1], [0, 0, 1, 1], [], []>} : vector<16x256xf32>, vector<256x256xf32>, vector<16x256xf32> -> vector<16x256xf32>
    %5 = math.tanh %4 : vector<16x256xf32>
    %6 = vector.shape_cast %5 : vector<16x256xf32> to vector<2x8x256xf32>
    %c0_4 = arith.constant 0 : index
    %c0_5 = arith.constant 0 : index
    %7 = vector.load %arg3[%c0_4, %c0_5] : memref<1x256xf32, #tpu.memory_space<vmem>>, vector<1x256xf32>
    %8 = vector.shape_cast %7 : vector<1x256xf32> to vector<1x1x256xf32>
    %9 = vector.broadcast %8 : vector<1x1x256xf32> to vector<2x8x256xf32>
    %10 = arith.mulf %6, %9 : vector<2x8x256xf32>
    %cst_6 = arith.constant dense<0.000000e+00> : vector<2x8xf32>
    %11 = vector.multi_reduction <add>, %10, %cst_6 [2] : vector<2x8x256xf32> to vector<2x8xf32>
    %12 = vector.shape_cast %11 : vector<2x8xf32> to vector<2x8x1xf32>
    %cst_7 = arith.constant 6.250000e-02 : f32
    %13 = vector.broadcast %cst_7 : f32 to vector<2x8x1xf32>
    %14 = arith.mulf %12, %13 : vector<2x8x1xf32>
    %15 = math.exp %14 : vector<2x8x1xf32>
    %cst_8 = arith.constant dense<0.000000e+00> : vector<2x1xf32>
    %16 = vector.multi_reduction <add>, %15, %cst_8 [1] : vector<2x8x1xf32> to vector<2x1xf32>
    %17 = vector.shape_cast %16 : vector<2x1xf32> to vector<2x1x1xf32>
    %18 = vector.broadcast %17 : vector<2x1x1xf32> to vector<2x8x1xf32>
    %19 = arith.divf %15, %18 : vector<2x8x1xf32>
    %20 = vector.broadcast %19 : vector<2x8x1xf32> to vector<2x8x256xf32>
    %21 = arith.mulf %20, %1 : vector<2x8x256xf32>
    %cst_9 = arith.constant dense<0.000000e+00> : vector<2x256xf32>
    %22 = vector.multi_reduction <add>, %21, %cst_9 [1] : vector<2x8x256xf32> to vector<2x256xf32>
    %c0_10 = arith.constant 0 : index
    %c0_11 = arith.constant 0 : index
    %23 = vector.load %arg4[%c0_10, %c0_11] : memref<2x256xf32, #tpu.memory_space<vmem>>, vector<2x256xf32>
    tpu.vector_store %arg4[%c0_10, %c0_11], %22 {strides = array<i32>} : memref<2x256xf32, #tpu.memory_space<vmem>>, vector<2x256xf32>,
    return
  }
  func.func @transform_0(%arg0: i32) -> (i32, i32, i32) {
    %c0_i32 = arith.constant 0 : i32
    %c0_i32_0 = arith.constant 0 : i32
    %c0_i32_1 = arith.constant 0 : i32
    return %arg0, %c0_i32, %c0_i32_0 : i32, i32, i32
  }
  func.func @transform_1(%arg0: i32) -> (i32, i32) {
    %c0_i32 = arith.constant 0 : i32
    %c0_i32_0 = arith.constant 0 : i32
    %c0_i32_1 = arith.constant 0 : i32
    return %c0_i32, %c0_i32_0 : i32, i32
  }
  func.func @transform_2(%arg0: i32) -> (i32, i32) {
    %c0_i32 = arith.constant 0 : i32
    %c0_i32_0 = arith.constant 0 : i32
    %c0_i32_1 = arith.constant 0 : i32
    return %c0_i32, %c0_i32_0 : i32, i32
  }
  func.func @transform_3(%arg0: i32) -> (i32, i32) {
    %c0_i32 = arith.constant 0 : i32
    %c0_i32_0 = arith.constant 0 : i32
    return %arg0, %c0_i32 : i32, i32
  }
}

</mosaic_0001>

<bundles_post_ra>
// kernel: tpu_custom_call.1
= control target key start
LH: loop header
LB: loop body
LE: loop exit
PB: predicated region body
PF: predicated region fallthrough
CT: control target
= control target key end

     0   :  { %s1045_s0 = inlined_call_operand.vmem [shape: f32[2,256,8], index: 0, kind: input, shape index: {}]   ;;  %s1046_s1 = inlined_call_operand.vmem [shape: f32[256,256], index: 1, kind: input, shape index: {}]   ;;  %s1047_s2 = inlined_call_operand.vmem [shape: f32[1,256], index: 2, kind: input, shape index: {}]   ;;  %s1048_s3 = inlined_call_operand.hbm [shape: f32[2,256], index: 3, kind: output, shape index: {}]  }
   0x1   :  { %v63_v0 = vld [vmem:[%s1045_s0 + $0x180] sm:$0xff]  ;;  %v64_v2 = vld [vmem:[%s1045_s0 + $0x188] sm:$0xff]  ;;  %v65_v4 = vld [vmem:[%s1045_s0 + $0x190] sm:$0xff] }
   0x2   :  { %v47_v1 = vld [vmem:[%s1045_s0 + $0x100] sm:$0xff]  ;;  %175 = vxpose.xlu0.b32.start [1/16] (narrow) %v63_v0, 8  ;;  %v48_v3 = vld [vmem:[%s1045_s0 + $0x108] sm:$0xff]  ;;  %v49_v5 = vld [vmem:[%s1045_s0 + $0x110] sm:$0xff] }
   0x3   :  { %143 = vxpose.xlu1.b32.start [1/16] (narrow) %v47_v1, 8  ;;  %v66_v6 = vld [vmem:[%s1045_s0 + $0x198] sm:$0xff]  ;;  %v208_v8 = vld [vmem:[%s1046_s1 + $0x8] sm:$0xff]  ;;  %v207_v11 = vld [vmem:[%s1046_s1] sm:$0xff] }
   0x4   :  { %v50_v7 = vld [vmem:[%s1045_s0 + $0x118] sm:$0xff]  ;;  %v209_v12 = vld [vmem:[%s1046_s1 + $0x10] sm:$0xff]  ;;  %v67_v13 = vld [vmem:[%s1045_s0 + $0x1a0] sm:$0xff] }
   0x5   :  { %v210_v9 = vld [vmem:[%s1046_s1 + $0x18] sm:$0xff]  ;;  %v475_v14 = vpack.c.bf16 %v209_v12, %v207_v11  ;;  %v212_v15 = vld [vmem:[%s1046_s1 + $0x28] sm:$0xff]  ;;  %v51_v17 = vld [vmem:[%s1045_s0 + $0x120] sm:$0xff] }
   0x6   :  { %176 = vxpose.xlu0.b32.cont [2/16] (narrow) %v64_v2, 8  ;;  %v473_v10 = vpack.c.bf16 %v210_v9, %v208_v8  ;;  %v214_v16 = vld [vmem:[%s1046_s1 + $0x38] sm:$0xff]  ;;  %v211_v19 = vld [vmem:[%s1046_s1 + $0x20] sm:$0xff]  ;;  %v213_v20 = vld [vmem:[%s1046_s1 + $0x30] sm:$0xff] }
   0x7   :  { %144 = vxpose.xlu1.b32.cont [2/16] (narrow) %v48_v3, 8  ;;  %v477_v18 = vpack.c.bf16 %v214_v16, %v212_v15  ;;  %v479_v21 = vpack.c.bf16 %v213_v20, %v211_v19  ;;  %v216_v22 = vld [vmem:[%s1046_s1 + $0x48] sm:$0xff]  ;;  %v218_v23 = vld [vmem:[%s1046_s1 + $0x58] sm:$0xff]  ;;  %v215_v25 = vld [vmem:[%s1046_s1 + $0x40] sm:$0xff] }
   0x8   :  { %537 = vmatprep.subr.bf16.mxu1 %v473_v10  ;;  %474 = vmatprep.subr.bf16.mxu0 %v473_v10  ;;  %v481_v24 = vpack.c.bf16 %v218_v23, %v216_v22  ;;  %v217_v26 = vld [vmem:[%s1046_s1 + $0x50] sm:$0xff]  ;;  %v220_v27 = vld [vmem:[%s1046_s1 + $0x68] sm:$0xff]  ;;  %v222_v28 = vld [vmem:[%s1046_s1 + $0x78] sm:$0xff] }
   0x9   :  { %553 = vmatpush1.bf16.msra.mxu1 %v475_v14  ;;  %476 = vmatpush1.bf16.msra.mxu0 %v475_v14  ;;  %v68_v29 = vld [vmem:[%s1045_s0 + $0x1a8] sm:$0xff]  ;;  %v483_v31 = vpack.c.bf16 %v217_v26, %v215_v25  ;;  %v485_v32 = vpack.c.bf16 %v222_v28, %v220_v27  ;;  %v219_v33 = vld [vmem:[%s1046_s1 + $0x60] sm:$0xff]  ;;  %v221_v34 = vld [vmem:[%s1046_s1 + $0x70] sm:$0xff] }
   0xa   :  { %177 = vxpose.xlu0.b32.cont [3/16] (narrow) %v65_v4, 8  ;;  %538 = vmatprep.subr.bf16.mxu1 %v477_v18  ;;  %v52_v30 = vld [vmem:[%s1045_s0 + $0x128] sm:$0xff]  ;;  %v226_v36 = vld [vmem:[%s1046_s1 + $0x98] sm:$0xff]  ;;  %v69_v37 = vld [vmem:[%s1045_s0 + $0x1b0] sm:$0xff]  ;;  %v487_v39 = vpack.c.bf16 %v221_v34, %v219_v33 }
   0xb   :  { %145 = vxpose.xlu1.b32.cont [3/16] (narrow) %v49_v5, 8  ;;  %478 = vmatprep.subr.bf16.mxu0 %v477_v18  ;;  %v224_v35 = vld [vmem:[%s1046_s1 + $0x88] sm:$0xff]  ;;  %v53_v38 = vld [vmem:[%s1045_s0 + $0x130] sm:$0xff]  ;;  %v223_v41 = vld [vmem:[%s1046_s1 + $0x80] sm:$0xff] }
   0xc   :  { %v489_v40 = vpack.c.bf16 %v226_v36, %v224_v35  ;;  %v225_v42 = vld [vmem:[%s1046_s1 + $0x90] sm:$0xff]  ;;  %v228_v43 = vld [vmem:[%s1046_s1 + $0xa8] sm:$0xff]  ;;  %v230_v44 = vld [vmem:[%s1046_s1 + $0xb8] sm:$0xff] }
   0xd   :  { %554 = vmatpush1.bf16.msra.mxu1 %v479_v21  ;;  %480 = vmatpush1.bf16.msra.mxu0 %v479_v21  ;;  %v70_v45 = vld [vmem:[%s1045_s0 + $0x1b8] sm:$0xff]  ;;  %v491_v47 = vpack.c.bf16 %v225_v42, %v223_v41  ;;  %v493_v48 = vpack.c.bf16 %v230_v44, %v228_v43  ;;  %v227_v49 = vld [vmem:[%s1046_s1 + $0xa0] sm:$0xff]  ;;  %v229_v50 = vld [vmem:[%s1046_s1 + $0xb0] sm:$0xff] }
   0xe   :  { %178 = vxpose.xlu0.b32.cont [4/16] (narrow) %v66_v6, 8  ;;  %539 = vmatprep.subr.bf16.mxu1 %v481_v24  ;;  %v54_v46 = vld [vmem:[%s1045_s0 + $0x138] sm:$0xff]  ;;  %v232_v51 = vld [vmem:[%s1046_s1 + $0xc8] sm:$0xff]  ;;  %v71_v53 = vld [vmem:[%s1045_s0 + $0x1c0] sm:$0xff]  ;;  %v495_v55 = vpack.c.bf16 %v229_v50, %v227_v49 }
   0xf   :  { %146 = vxpose.xlu1.b32.cont [4/16] (narrow) %v50_v7, 8  ;;  %482 = vmatprep.subr.bf16.mxu0 %v481_v24  ;;  %v234_v52 = vld [vmem:[%s1046_s1 + $0xd8] sm:$0xff]  ;;  %v55_v54 = vld [vmem:[%s1045_s0 + $0x140] sm:$0xff]  ;;  %v233_v58 = vld [vmem:[%s1046_s1 + $0xd0] sm:$0xff] }
  0x10   :  { %v497_v56 = vpack.c.bf16 %v234_v52, %v232_v51  ;;  %v231_v57 = vld [vmem:[%s1046_s1 + $0xc0] sm:$0xff]  ;;  %v236_v59 = vld [vmem:[%s1046_s1 + $0xe8] sm:$0xff]  ;;  %v238_v60 = vld [vmem:[%s1046_s1 + $0xf8] sm:$0xff] }
  0x11   :  { %555 = vmatpush1.bf16.msra.mxu1 %v483_v31  ;;  %484 = vmatpush1.bf16.msra.mxu0 %v483_v31  ;;  %v72_v61 = vld [vmem:[%s1045_s0 + $0x1c8] sm:$0xff]  ;;  %v499_v63 = vpack.c.bf16 %v233_v58, %v231_v57  ;;  %v501_v0 = vpack.c.bf16 %v238_v60, %v236_v59  ;;  %v235_v1 = vld [vmem:[%s1046_s1 + $0xe0] sm:$0xff]  ;;  %v237_v2 = vld [vmem:[%s1046_s1 + $0xf0] sm:$0xff] }
  0x12   :  { %179 = vxpose.xlu0.b32.cont [5/16] (narrow) %v67_v13, 8  ;;  %540 = vmatprep.subr.bf16.mxu1 %v485_v32  ;;  %v56_v62 = vld [vmem:[%s1045_s0 + $0x148] sm:$0xff]  ;;  %v242_v4 = vld [vmem:[%s1046_s1 + $0x118] sm:$0xff]  ;;  %v73_v5 = vld [vmem:[%s1045_s0 + $0x1d0] sm:$0xff]  ;;  %v503_v7 = vpack.c.bf16 %v237_v2, %v235_v1 }
  0x13   :  { %147 = vxpose.xlu1.b32.cont [5/16] (narrow) %v51_v17, 8  ;;  %486 = vmatprep.subr.bf16.mxu0 %v485_v32  ;;  %v240_v3 = vld [vmem:[%s1046_s1 + $0x108] sm:$0xff]  ;;  %v57_v6 = vld [vmem:[%s1045_s0 + $0x150] sm:$0xff]  ;;  %v239_v9 = vld [vmem:[%s1046_s1 + $0x100] sm:$0xff] }
  0x14   :  { %v505_v8 = vpack.c.bf16 %v242_v4, %v240_v3  ;;  %v241_v10 = vld [vmem:[%s1046_s1 + $0x110] sm:$0xff]  ;;  %v244_v11 = vld [vmem:[%s1046_s1 + $0x128] sm:$0xff]  ;;  %v246_v12 = vld [vmem:[%s1046_s1 + $0x138] sm:$0xff] }
  0x15   :  { %556 = vmatpush1.bf16.msra.mxu1 %v487_v39  ;;  %488 = vmatpush1.bf16.msra.mxu0 %v487_v39  ;;  %v74_v13 = vld [vmem:[%s1045_s0 + $0x1d8] sm:$0xff] }
  0x16   :  { %180 = vxpose.xlu0.b32.cont [6/16] (narrow) %v68_v29, 8  ;;  %541 = vmatprep.subr.bf16.mxu1 %v489_v40  ;;  %v58_v14 = vld [vmem:[%s1045_s0 + $0x158] sm:$0xff] }
  0x17   :  { %148 = vxpose.xlu1.b32.cont [6/16] (narrow) %v52_v30, 8  ;;  %490 = vmatprep.subr.bf16.mxu0 %v489_v40 }
  0x19   :  { %557 = vmatpush1.bf16.msra.mxu1 %v491_v47  ;;  %492 = vmatpush1.bf16.msra.mxu0 %v491_v47 }
  0x1a   :  { %181 = vxpose.xlu0.b32.cont [7/16] (narrow) %v69_v37, 8  ;;  %542 = vmatprep.subr.bf16.mxu1 %v493_v48 }
  0x1b   :  { %149 = vxpose.xlu1.b32.cont [7/16] (narrow) %v53_v38, 8  ;;  %494 = vmatprep.subr.bf16.mxu0 %v493_v48 }
  0x1d   :  { %558 = vmatpush1.bf16.msra.mxu1 %v495_v55  ;;  %496 = vmatpush1.bf16.msra.mxu0 %v495_v55 }
  0x1e   :  { %182 = vxpose.xlu0.b32.cont [8/16] (narrow) %v70_v45, 8  ;;  %543 = vmatprep.subr.bf16.mxu1 %v497_v56 }
  0x1f   :  { %150 = vxpose.xlu1.b32.cont [8/16] (narrow) %v54_v46, 8  ;;  %498 = vmatprep.subr.bf16.mxu0 %v497_v56 }
  0x21   :  { %559 = vmatpush1.bf16.msra.mxu1 %v499_v63  ;;  %500 = vmatpush1.bf16.msra.mxu0 %v499_v63 }
  0x22   :  { %183 = vxpose.xlu0.b32.cont [9/16] (narrow) %v71_v53, 8  ;;  %544 = vmatprep.subr.bf16.mxu1 %v501_v0 }
  0x23   :  { %151 = vxpose.xlu1.b32.cont [9/16] (narrow) %v55_v54, 8  ;;  %502 = vmatprep.subr.bf16.mxu0 %v501_v0 }
  0x26   :  { %184 = vxpose.xlu0.b32.cont [10/16] (narrow) %v72_v61, 8 }
  0x27   :  { %152 = vxpose.xlu1.b32.cont [10/16] (narrow) %v56_v62, 8 }
  0x2a   :  { %185 = vxpose.xlu0.b32.cont [11/16] (narrow) %v73_v5, 8 }
  0x2b   :  { %153 = vxpose.xlu1.b32.cont [11/16] (narrow) %v57_v6, 8 }
  0x2c   :  { %8 = vsyncpa [#allocation3], 0  ;;  %560 = vmatpush1.bf16.msra.mxu1 %v503_v7  ;;  %v507_v15 = vpack.c.bf16 %v241_v10, %v239_v9  ;;  %504 = vmatpush1.bf16.msra.mxu0 %v503_v7  ;;  %v509_v16 = vpack.c.bf16 %v246_v12, %v244_v11  ;;  %v243_v17 = vld [vmem:[%s1046_s1 + $0x120] sm:$0xff]  ;;  %v245_v18 = vld [vmem:[%s1046_s1 + $0x130] sm:$0xff]  ;;  %vm449_vm0 = vcmask 1041409   ;;  %vm451_vm1 = vcmask 1043459  }
  0x2d   :  { %545 = vmatprep.subr.bf16.mxu1 %v505_v8  ;;  %506 = vmatprep.subr.bf16.mxu0 %v505_v8  ;;  %v248_v19 = vld [vmem:[%s1046_s1 + $0x148] sm:$0xff]  ;;  %v250_v20 = vld [vmem:[%s1046_s1 + $0x158] sm:$0xff]  ;;  %v75_v21 = vld [vmem:[%s1045_s0 + $0x1e0] sm:$0xff]  ;;  %v511_v23 = vpack.c.bf16 %v245_v18, %v243_v17  ;;  %vm453_vm2 = vcmask 1045509   ;;  %vm455_vm3 = vcmask 1047559  }
  0x2e   :  { %186 = vxpose.xlu0.b32.cont [12/16] (narrow) %v74_v13, 8  ;;  %v59_v22 = vld [vmem:[%s1045_s0 + $0x160] sm:$0xff]  ;;  %v513_v24 = vpack.c.bf16 %v250_v20, %v248_v19  ;;  %v249_v26 = vld [vmem:[%s1046_s1 + $0x150] sm:$0xff]  ;;  %v252_v27 = vld [vmem:[%s1046_s1 + $0x168] sm:$0xff] }
  0x2f   :  { %154 = vxpose.xlu1.b32.cont [12/16] (narrow) %v58_v14, 8  ;;  %v247_v25 = vld [vmem:[%s1046_s1 + $0x140] sm:$0xff]  ;;  %v254_v28 = vld [vmem:[%s1046_s1 + $0x178] sm:$0xff]  ;;  %v76_v29 = vld [vmem:[%s1045_s0 + $0x1e8] sm:$0xff] }
  0x30   :  { %561 = vmatpush1.bf16.msra.mxu1 %v507_v15  ;;  %508 = vmatpush1.bf16.msra.mxu0 %v507_v15  ;;  %v60_v30 = vld [vmem:[%s1045_s0 + $0x168] sm:$0xff]  ;;  %v515_v31 = vpack.c.bf16 %v249_v26, %v247_v25  ;;  %v517_v32 = vpack.c.bf16 %v254_v28, %v252_v27  ;;  %v251_v33 = vld [vmem:[%s1046_s1 + $0x160] sm:$0xff]  ;;  %v253_v34 = vld [vmem:[%s1046_s1 + $0x170] sm:$0xff] }
  0x31   :  { %546 = vmatprep.subr.bf16.mxu1 %v509_v16  ;;  %510 = vmatprep.subr.bf16.mxu0 %v509_v16  ;;  %v256_v35 = vld [vmem:[%s1046_s1 + $0x188] sm:$0xff]  ;;  %v258_v36 = vld [vmem:[%s1046_s1 + $0x198] sm:$0xff]  ;;  %v77_v37 = vld [vmem:[%s1045_s0 + $0x1f0] sm:$0xff]  ;;  %v519_v39 = vpack.c.bf16 %v253_v34, %v251_v33 }
  0x32   :  { %187 = vxpose.xlu0.b32.cont [13/16] (narrow) %v75_v21, 8  ;;  %v61_v38 = vld [vmem:[%s1045_s0 + $0x170] sm:$0xff]  ;;  %v521_v40 = vpack.c.bf16 %v258_v36, %v256_v35  ;;  %v255_v41 = vld [vmem:[%s1046_s1 + $0x180] sm:$0xff]  ;;  %v260_v43 = vld [vmem:[%s1046_s1 + $0x1a8] sm:$0xff]  ;;  %v354_v36 = vlaneseq }
  0x33   :  { %155 = vxpose.xlu1.b32.cont [13/16] (narrow) %v59_v22, 8  ;;  %v257_v42 = vld [vmem:[%s1046_s1 + $0x190] sm:$0xff]  ;;  %v262_v44 = vld [vmem:[%s1046_s1 + $0x1b8] sm:$0xff]  ;;  %v259_v49 = vld [vmem:[%s1046_s1 + $0x1a0] sm:$0xff] }
  0x34   :  { %562 = vmatpush1.bf16.msra.mxu1 %v511_v23  ;;  %512 = vmatpush1.bf16.msra.mxu0 %v511_v23  ;;  %v78_v45 = vld [vmem:[%s1045_s0 + $0x1f8] sm:$0xff]  ;;  %v523_v47 = vpack.c.bf16 %v257_v42, %v255_v41  ;;  %v525_v48 = vpack.c.bf16 %v262_v44, %v260_v43  ;;  %v261_v50 = vld [vmem:[%s1046_s1 + $0x1b0] sm:$0xff]  ;;  %v264_v51 = vld [vmem:[%s1046_s1 + $0x1c8] sm:$0xff] }
  0x35   :  { %547 = vmatprep.subr.bf16.mxu1 %v513_v24  ;;  %514 = vmatprep.subr.bf16.mxu0 %v513_v24  ;;  %v62_v46 = vld [vmem:[%s1045_s0 + $0x178] sm:$0xff]  ;;  %v31_v53 = vld [vmem:[%s1045_s0 + $0x80] sm:$0xff]  ;;  %v527_v55 = vpack.c.bf16 %v261_v50, %v259_v49  ;;  %v265_v58 = vld [vmem:[%s1046_s1 + $0x1d0] sm:$0xff] }
  0x36   :  { %188 = vxpose.xlu0.b32.cont [14/16] (narrow) %v76_v29, 8  ;;  %v266_v52 = vld [vmem:[%s1046_s1 + $0x1d8] sm:$0xff]  ;;  %v15_v54 = vld [vmem:[%s1045_s0] sm:$0xff]  ;;  %v268_v59 = vld [vmem:[%s1046_s1 + $0x1e8] sm:$0xff] }
  0x37   :  { %156 = vxpose.xlu1.b32.cont [14/16] (narrow) %v60_v30, 8  ;;  %v529_v56 = vpack.c.bf16 %v266_v52, %v264_v51  ;;  %v263_v57 = vld [vmem:[%s1046_s1 + $0x1c0] sm:$0xff]  ;;  %v270_v60 = vld [vmem:[%s1046_s1 + $0x1f8] sm:$0xff]  ;;  %v32_v61 = vld [vmem:[%s1045_s0 + $0x88] sm:$0xff] }
  0x38   :  { %563 = vmatpush1.bf16.msra.mxu1 %v515_v31  ;;  %516 = vmatpush1.bf16.msra.mxu0 %v515_v31  ;;  %v16_v62 = vld [vmem:[%s1045_s0 + $0x8] sm:$0xff]  ;;  %v531_v63 = vpack.c.bf16 %v265_v58, %v263_v57  ;;  %v533_v0 = vpack.c.bf16 %v270_v60, %v268_v59  ;;  %v267_v1 = vld [vmem:[%s1046_s1 + $0x1e0] sm:$0xff]  ;;  %v269_v2 = vld [vmem:[%s1046_s1 + $0x1f0] sm:$0xff] }
  0x39   :  { %548 = vmatprep.subr.bf16.mxu1 %v517_v32  ;;  %518 = vmatprep.subr.bf16.mxu0 %v517_v32  ;;  %v33_v3 = vld [vmem:[%s1045_s0 + $0x90] sm:$0xff]  ;;  %v535_v5 = vpack.c.bf16 %v269_v2, %v267_v1  ;;  %v34_v6 = vld [vmem:[%s1045_s0 + $0x98] sm:$0xff]  ;;  %v35_v8 = vld [vmem:[%s1045_s0 + $0xa0] sm:$0xff] }
  0x3a   :  { %189 = vxpose.xlu0.b32.cont [15/16] (narrow) %v77_v37, 8  ;;  %v17_v4 = vld [vmem:[%s1045_s0 + $0x10] sm:$0xff]  ;;  %v18_v7 = vld [vmem:[%s1045_s0 + $0x18] sm:$0xff]  ;;  %v19_v9 = vld [vmem:[%s1045_s0 + $0x20] sm:$0xff] }
  0x3b   :  { %157 = vxpose.xlu1.b32.cont [15/16] (narrow) %v61_v38, 8  ;;  %v36_v10 = vld [vmem:[%s1045_s0 + $0xa8] sm:$0xff]  ;;  %v37_v12 = vld [vmem:[%s1045_s0 + $0xb0] sm:$0xff]  ;;  %v38_v14 = vld [vmem:[%s1045_s0 + $0xb8] sm:$0xff]  ;;  %v1023_v38 = vshrl.u32 %v354_v36, 7 }
  0x3c   :  { %564 = vmatpush1.bf16.msra.mxu1 %v519_v39  ;;  %520 = vmatpush1.bf16.msra.mxu0 %v519_v39  ;;  %v20_v11 = vld [vmem:[%s1045_s0 + $0x28] sm:$0xff]  ;;  %v21_v13 = vld [vmem:[%s1045_s0 + $0x30] sm:$0xff]  ;;  %v22_v15 = vld [vmem:[%s1045_s0 + $0x38] sm:$0xff] }
  0x3d   :  { %549 = vmatprep.subr.bf16.mxu1 %v521_v40  ;;  %522 = vmatprep.subr.bf16.mxu0 %v521_v40  ;;  %v39_v16 = vld [vmem:[%s1045_s0 + $0xc0] sm:$0xff]  ;;  %v40_v18 = vld [vmem:[%s1045_s0 + $0xc8] sm:$0xff]  ;;  %v41_v20 = vld [vmem:[%s1045_s0 + $0xd0] sm:$0xff]  ;;  %v356_v40 = vsub.s32 0, %v1023_v38  ;;  %v360_v42 = vsub.s32 1, %v1023_v38 }
  0x3e   :  { %190 = vxpose.xlu0.b32.end [16/16] (narrow) %v78_v45, 8  ;;  %v23_v17 = vld [vmem:[%s1045_s0 + $0x40] sm:$0xff]  ;;  %v24_v19 = vld [vmem:[%s1045_s0 + $0x48] sm:$0xff]  ;;  %v25_v21 = vld [vmem:[%s1045_s0 + $0x50] sm:$0xff] }
  0x3f   :  { %158 = vxpose.xlu1.b32.end [16/16] (narrow) %v62_v46, 8  ;;  %v42_v22 = vld [vmem:[%s1045_s0 + $0xd8] sm:$0xff]  ;;  %v43_v24 = vld [vmem:[%s1045_s0 + $0xe0] sm:$0xff]  ;;  %v44_v26 = vld [vmem:[%s1045_s0 + $0xe8] sm:$0xff] }
  0x40   :  { %565 = vmatpush1.bf16.msra.mxu1 %v523_v47  ;;  %524 = vmatpush1.bf16.msra.mxu0 %v523_v47  ;;  %v26_v23 = vld [vmem:[%s1045_s0 + $0x58] sm:$0xff]  ;;  %v27_v25 = vld [vmem:[%s1045_s0 + $0x60] sm:$0xff]  ;;  %v28_v27 = vld [vmem:[%s1045_s0 + $0x68] sm:$0xff] }
  0x41   :  { %550 = vmatprep.subr.bf16.mxu1 %v525_v48  ;;  %526 = vmatprep.subr.bf16.mxu0 %v525_v48  ;;  %v45_v28 = vld [vmem:[%s1045_s0 + $0xf0] sm:$0xff]  ;;  %v46_v30 = vld [vmem:[%s1045_s0 + $0xf8] sm:$0xff]  ;;  %v352_v41 = vld [vmem:[%s1047_s2] sm:$0x3]  ;;  %s612_s2 = smov [#allocation2]  }
  0x42   :  { %111 = vxpose.xlu0.b32.start [1/16] (narrow) %v31_v53, 8  ;;  %v29_v29 = vld [vmem:[%s1045_s0 + $0x70] sm:$0xff]  ;;  %v30_v31 = vld [vmem:[%s1045_s0 + $0x78] sm:$0xff]  ;;  %v357_v43 = vrot.slane %v352_v41, %v356_v40  ;;  %v361_v44 = vrot.slane %v352_v41, %v360_v42  ;;  %s465_s24 = sshll.u32 %s612_s2, 4  ;;  %s466_s24 = int_to_ptr.vmem [resolvable:$true] %s465_s24 }
  0x43   :  { %79 = vxpose.xlu1.b32.start [1/16] (narrow) %v15_v54, 8  ;;  %s587_s25 = scalar_lea.vmem %s466_s24, 64  ;;  %p592_p1 = scmp.lt.s32.totalorder %s466_s24, %s466_s24 }
  0x44   :  { %566 = vmatpush1.bf16.msra.mxu1 %v527_v55  ;;  %528 = vmatpush1.bf16.msra.mxu0 %v527_v55  ;;  %p588_p0 = scmp.ne.s32.totalorder %s466_s24, %s587_s25  ;;  %p593_p2 = scmp.lt.s32.totalorder %s587_s25, %s587_s25 }
  0x45   :  { %551 = vmatprep.subr.bf16.mxu1 %v529_v56  ;;  %530 = vmatprep.subr.bf16.mxu0 %v529_v56 }
  0x46   :  { %112 = vxpose.xlu0.b32.cont [2/16] (narrow) %v32_v61, 8  ;;  %p594_p3 = por %p593_p2, %p592_p1 }
  0x47   :  { %80 = vxpose.xlu1.b32.cont [2/16] (narrow) %v16_v62, 8 }
  0x48   :  { %567 = vmatpush1.bf16.msra.mxu1 %v531_v63  ;;  %532 = vmatpush1.bf16.msra.mxu0 %v531_v63  ;;  %p595_p4 = pnand %p594_p3, %p588_p0 }
  0x49   :  { %552 = vmatprep.subr.bf16.mxu1 %v533_v0  ;;  %534 = vmatprep.subr.bf16.mxu0 %v533_v0 }
  0x4a   :  { %113 = vxpose.xlu0.b32.cont [3/16] (narrow) %v33_v3, 8 }
  0x4b   :  { %81 = vxpose.xlu1.b32.cont [3/16] (narrow) %v17_v4, 8 }
  0x4c   :  { %568 = vmatpush1.bf16.msra.mxu1 %v535_v5  ;;  %536 = vmatpush1.bf16.msra.mxu0 %v535_v5 }
  0x4e   :  { %114 = vxpose.xlu0.b32.cont [4/16] (narrow) %v34_v6, 8 }
  0x4f   :  { %82 = vxpose.xlu1.b32.cont [4/16] (narrow) %v18_v7, 8 }
  0x52   :  { %115 = vxpose.xlu0.b32.cont [5/16] (narrow) %v35_v8, 8 }
  0x53   :  { %83 = vxpose.xlu1.b32.cont [5/16] (narrow) %v19_v9, 8 }
  0x56   :  { %116 = vxpose.xlu0.b32.cont [6/16] (narrow) %v36_v10, 8 }
  0x57   :  { %84 = vxpose.xlu1.b32.cont [6/16] (narrow) %v20_v11, 8 }
  0x5a   :  { %117 = vxpose.xlu0.b32.cont [7/16] (narrow) %v37_v12, 8 }
  0x5b   :  { %85 = vxpose.xlu1.b32.cont [7/16] (narrow) %v21_v13, 8 }
  0x5e   :  { %118 = vxpose.xlu0.b32.cont [8/16] (narrow) %v38_v14, 8 }
  0x5f   :  { %86 = vxpose.xlu1.b32.cont [8/16] (narrow) %v22_v15, 8 }
  0x62   :  { %119 = vxpose.xlu0.b32.cont [9/16] (narrow) %v39_v16, 8 }
  0x63   :  { %87 = vxpose.xlu1.b32.cont [9/16] (narrow) %v23_v17, 8 }
  0x66   :  { %120 = vxpose.xlu0.b32.cont [10/16] (narrow) %v40_v18, 8 }
  0x67   :  { %88 = vxpose.xlu1.b32.cont [10/16] (narrow) %v24_v19, 8 }
  0x6a   :  { %121 = vxpose.xlu0.b32.cont [11/16] (narrow) %v41_v20, 8 }
  0x6b   :  { %89 = vxpose.xlu1.b32.cont [11/16] (narrow) %v25_v21, 8 }
  0x6e   :  { %122 = vxpose.xlu0.b32.cont [12/16] (narrow) %v42_v22, 8 }
  0x6f   :  { %90 = vxpose.xlu1.b32.cont [12/16] (narrow) %v26_v23, 8 }
  0x72   :  { %123 = vxpose.xlu0.b32.cont [13/16] (narrow) %v43_v24, 8 }
  0x73   :  { %91 = vxpose.xlu1.b32.cont [13/16] (narrow) %v27_v25, 8 }
  0x76   :  { %124 = vxpose.xlu0.b32.cont [14/16] (narrow) %v44_v26, 8 }
  0x77   :  { %92 = vxpose.xlu1.b32.cont [14/16] (narrow) %v28_v27, 8  ;;  %v611_v27 = vmov 1983009808  }
  0x7a   :  { %125 = vxpose.xlu0.b32.cont [15/16] (narrow) %v45_v28, 8  ;;  %v430_v28 = vunpack.c.l.s4 %v611_v27 }
  0x7b   :  { %93 = vxpose.xlu1.b32.cont [15/16] (narrow) %v29_v29, 8 }
  0x7e   :  { %126 = vxpose.xlu0.b32.end [16/16] (narrow) %v46_v30, 8 }
  0x7f   :  { %94 = vxpose.xlu1.b32.end [16/16] (narrow) %v30_v31, 8 }
  0x82   :  { %v191_v32 = vpop.trf.xlu0 }
  0x83   :  { %v159_v33 = vpop.trf.xlu1  ;;  %341 = vmatprep.mubr.f32.mxu1 %v191_v32 }
  0x84   :  { %342 = vmatmul.mubr.f32.vlgmr.msra.gmra.mrb[0].mxu1 %v159_v33 }
  0xc2   :  { %v1017_v34 = vpop.trf.xlu0 }
  0xc3   :  { %v1019_v35 = vpop.trf.xlu1  ;;  %335 = vmatprep.mubr.f32.mxu0 %v1017_v34 }
  0xc4   :  { %336 = vmatmul.mubr.f32.vlgmr.msra.gmra.mrb[0].mxu0 %v1019_v35 }
 0x157   :  { %v343_v37 = vpop.f32.mrb[0].mxu1 }
 0x158   :  { %571 = vtanh.f32 %v343_v37  ;;  %v345_v39 = vpop.f32.mrb[1].mxu1  ;;  %v431_v37 = vunpack.c.0.s8 %v430_v28 }
 0x159   :  { %573 = vtanh.f32 %v345_v39 }
 0x162   :  { %v572_v45 = vpop.eup %571 }
 0x163   :  { %v574_v46 = vpop.eup %573  ;;  %v366_v47 = vmul.f32 %v572_v45, %v357_v43 }
 0x164   :  { %v367_v48 = vmul.f32 %v574_v46, %v361_v44 }
 0x166   :  { %v371_v49 = vadd.f32 %v367_v48, %v366_v47  ;;  %v434_v47 = vsub.s32 %v431_v37, %v1023_v38 }
 0x168   :  { %372 = vadd.xlane.f32.xlu0 %v371_v49 }
 0x197   :  { %v337_v50 = vpop.f32.mrb[0].mxu0 }
 0x198   :  { %575 = vtanh.f32 %v337_v50  ;;  %v339_v51 = vpop.f32.mrb[1].mxu0 }
 0x199   :  { %577 = vtanh.f32 %v339_v51 }
 0x1a2   :  { %v576_v52 = vpop.eup %575 }
 0x1a3   :  { %v578_v53 = vpop.eup %577  ;;  %v364_v54 = vmul.f32 %v576_v52, %v357_v43 }
 0x1a4   :  { %v365_v55 = vmul.f32 %v578_v53, %v361_v44 }
 0x1a6   :  { %v368_v56 = vadd.f32 %v365_v55, %v364_v54 }
 0x1a8   :  { %369 = vadd.xlane.f32.xlu1 %v368_v56 }
 0x1f5   :  { %v373_v57 = vpop.xlane.xlu0 %372 }
 0x1f6   :  { %v375_v58 = vmul.f32 0.0625, %v373_v57 }
 0x1f8   :  { %v378_v59 = vmul.f32 1.442695, %v375_v58 }
 0x1fa   :  { %579 = vpow2.f32 %v378_v59 }
 0x204   :  { %v580_v60 = vpop.eup %579 }
 0x205   :  { %v386_v61 = vrot.slane %v580_v60, 4 }
 0x207   :  { %v387_v62 = vadd.f32 %v580_v60, %v386_v61 }
 0x209   :  { %v388_v63 = vrot.slane %v387_v62, 2 }
 0x20b   :  { %v389_v0 = vadd.f32 %v388_v63, %v387_v62 }
 0x20d   :  { %v390_v1 = vrot.slane %v389_v0, 1 }
 0x20f   :  { %v391_v2 = vadd.f32 %v390_v1, %v389_v0 }
 0x211   :  { %581 = vrcp.f32 %v391_v2 }
 0x21b   :  { %v582_v6 = vpop.eup %581 }
 0x21c   :  { %v395_v9 = vmul.f32 %v582_v6, %v580_v60 }
 0x21e   :  { %v398_v12 = vmul.f32 %v395_v9, %v159_v33  ;;  %v399_v13 = vmul.f32 %v395_v9, %v191_v32 }
 0x220   :  { %v412_v16 = vrot.slane %v398_v12, 4  ;;  %v418_v17 = vrot.slane %v399_v13, 4 }
 0x222   :  { %v413_v19 = vadd.f32 %v412_v16, %v398_v12  ;;  %v419_v20 = vadd.f32 %v418_v17, %v399_v13 }
 0x224   :  { %v414_v21 = vrot.slane %v413_v19, 2  ;;  %v420_v22 = vrot.slane %v419_v20, 2 }
 0x226   :  { %v415_v23 = vadd.f32 %v414_v21, %v413_v19  ;;  %v421_v24 = vadd.f32 %v420_v22, %v419_v20 }
 0x228   :  { %v416_v31 = vrot.slane %v415_v23, 1  ;;  %v422_v32 = vrot.slane %v421_v24, 1 }
 0x22a   :  { %v417_v41 = vadd.f32 %v416_v31, %v415_v23  ;;  %v423_v42 = vadd.f32 %v422_v32, %v421_v24 }
 0x22c   :  { %v436_v48 = vcombine.low %v417_v41, %v423_v42 }
 0x22e   :  { %v443_v51 = vrot.slane %v436_v48, %v434_v47 }
 0x230   :  { %v448_v54 = vrot.slane %v443_v51, 7 }
 0x235   :  { %v370_v3 = vpop.xlane.xlu1 %369 }
 0x236   :  { %v374_v4 = vmul.f32 0.0625, %v370_v3 }
 0x238   :  { %v376_v5 = vmul.f32 1.442695, %v374_v4 }
 0x23a   :  { %583 = vpow2.f32 %v376_v5 }
 0x244   :  { %v584_v7 = vpop.eup %583 }
 0x245   :  { %v380_v8 = vrot.slane %v584_v7, 4 }
 0x247   :  { %v381_v10 = vadd.f32 %v584_v7, %v380_v8 }
 0x249   :  { %v382_v11 = vrot.slane %v381_v10, 2 }
 0x24b   :  { %v383_v14 = vadd.f32 %v382_v11, %v381_v10 }
 0x24d   :  { %v384_v15 = vrot.slane %v383_v14, 1 }
 0x24f   :  { %v385_v18 = vadd.f32 %v384_v15, %v383_v14 }
 0x251   :  { %585 = vrcp.f32 %v385_v18 }
 0x25b   :  { %v586_v25 = vpop.eup %585 }
 0x25c   :  { %v393_v26 = vmul.f32 %v586_v25, %v584_v7 }
 0x25e   :  { %v396_v29 = vmul.f32 %v393_v26, %v1019_v35  ;;  %v397_v30 = vmul.f32 %v393_v26, %v1017_v34 }
 0x260   :  { %v400_v33 = vrot.slane %v396_v29, 4  ;;  %v406_v36 = vrot.slane %v397_v30, 4 }
 0x262   :  { %v401_v39 = vadd.f32 %v400_v33, %v396_v29  ;;  %v407_v40 = vadd.f32 %v406_v36, %v397_v30 }
 0x264   :  { %v402_v43 = vrot.slane %v401_v39, 2  ;;  %v408_v44 = vrot.slane %v407_v40, 2 }
 0x266   :  { %v403_v45 = vadd.f32 %v402_v43, %v401_v39  ;;  %v409_v46 = vadd.f32 %v408_v44, %v407_v40 }
 0x268   :  { %v404_v49 = vrot.slane %v403_v45, 1  ;;  %v410_v35 = vrot.slane %v409_v46, 1 }
 0x26a   :  { %v405_v50 = vadd.f32 %v404_v49, %v403_v45  ;;  %v411_v34 = vadd.f32 %v410_v35, %v409_v46 }
 0x26c   :  { %v428_v52 = vcombine.low %v405_v50, %v411_v34 }
 0x26e   :  { %v435_v53 = vrot.slane %v428_v52, %v434_v47 }
 0x270   :  { %v450_v55 = vsel %vm449_vm0, %v448_v54, %v435_v53 }
 0x271   :  { %v452_v56 = vsel %vm451_vm1, %v448_v54, %v450_v55 }
 0x272   :  { %v454_v57 = vsel %vm453_vm2, %v448_v54, %v452_v56 }
 0x273   :  { %v456_v38 = vsel %vm455_vm3, %v448_v54, %v454_v57 }
 0x274   :  { %458 = vst [vmem:[#allocation2] sm:$0xf] %v456_v38 }
 0x275   :  { %598 = shalt.err (!%p595_p4)
}
 0x276   :  { %s599_s1 = scalar_lea.hbm %s1048_s3, 64 }
 0x277   :  { %p600_p5 = scmp.ne.s32.totalorder %s1048_s3, %s599_s1  ;;  %p603_p6 = scmp.lt.u32.totalorder %s599_s1, %s1048_s3 }
 0x279   :  { %p605_p7 = pnand %p603_p6, %p600_p5 }
 0x27b   :  { %608 = shalt.err (!%p605_p7)
}
 0x27c   :  { %468 = dma.vmem_to_hbm [thread:$0]  %s466_s24, 64, %s1048_s3, [#allocation3]  }
 0x27d   :  { %609 = dma.done.wait [#allocation3], 64  }
 0x27e   :  { %610 = vsyncadd [#allocation3], 4294967232 }
 0x27f   :  { %472 = vsyncpa [#allocation3], 1 }

</bundles_post_ra>
